<compile_context>
chip_gen: v5e
topology: v5e:2x2
jax: 0.10.0
libtpu: 0.0.40
codegen_flags: <defaults>
</compile_context>

<pallas_src>
import functools

import jax
import jax.numpy as jnp
from jax import lax
from jax.experimental import pallas as pl
from jax.experimental.pallas import tpu as pltpu


# --------------------------------------------------------------------------
# BitLinear kernel: y = act_quant(rmsnorm(x)) @ W_q^T
#   x tile: (tm, K)   W_q tile (pre-quantized): (tn, K)   y tile: (tm, tn)
# Grid is (M tiles, N tiles), both parallel (megacore shards them). The x
# tile's block index is constant along the N axis, so it stays VMEM-resident
# while weight tiles stream; for small N the weight is a single resident tile.
# --------------------------------------------------------------------------
def bitlinear_kernel(x_ref, wq_ref, o_ref):
    x = x_ref[...].astype(jnp.float32)            # (tm, K)
    wq = wq_ref[...].astype(jnp.float32)          # (tn, K) pre-quantized weight

    # SimpleRMSNorm (no learnable gain): x * rsqrt(mean(x^2)) — rsqrt on EUP.
    inv_rms = lax.rsqrt(jnp.mean(x * x, axis=-1, keepdims=True) + 1e-6)
    x_norm = x * inv_rms

    # Activation quant: per-row absmax -> int8 grid, dequantized back to f32.
    absmax = jnp.maximum(jnp.max(jnp.abs(x_norm), axis=-1, keepdims=True), 1e-5)
    scale = 127.0 * pl.reciprocal(absmax, approx=True)   # EUP, frees VALU slots
    inv_scale = absmax * (1.0 / 127.0)
    x_q = jnp.clip(jnp.round(x_norm * scale), -128.0, 127.0) * inv_scale

    # Contract last dims of both operands -> no materialized weight transpose.
    o_ref[...] = lax.dot_general(
        x_q, wq,
        dimension_numbers=(((1,), (1,)), ((), ())),
        preferred_element_type=jnp.float32,
    )


def bitlinear(x2d, wq, *, tm=512, tn=1024):
    """x2d: (M, K), wq: (N, K) pre-quantized weight. Returns (M, N) f32."""
    M, K = x2d.shape
    N = wq.shape[0]
    tm = min(tm, M)
    tn = min(tn, N)
    grid = (pl.cdiv(M, tm), pl.cdiv(N, tn))
    return pl.pallas_call(
        bitlinear_kernel,
        out_shape=jax.ShapeDtypeStruct((M, N), jnp.float32),
        grid=grid,
        in_specs=[
            pl.BlockSpec((tm, K), lambda i, j: (i, 0)),   # activation tile (resident over j)
            pl.BlockSpec((tn, K), lambda i, j: (j, 0)),   # weight tiles stream / stay resident
        ],
        out_specs=pl.BlockSpec((tm, tn), lambda i, j: (i, j)),
        compiler_params=pltpu.CompilerParams(
            dimension_semantics=("parallel", "parallel"),
            vmem_limit_bytes=32 * 1024 * 1024,
        ),
    )(x2d, wq)


# --------------------------------------------------------------------------
# Attention kernel: one grid step per (batch, query-tile); all heads batched
# in the block so per-step overhead is amortized and DMA blocks are larger.
# K/V block indices are constant along the query-tile axis, so K/V stay
# VMEM-resident while query tiles pipeline.
#   q: (B, H, Nq, D), k/v: (B, H, Nk, D) -> out: (B, H, Nq, D)
# TODO(synk): for very long contexts, tile Nk with an online-softmax (flash)
#             accumulator; full (H, tq, Nk) scores fit VMEM at these sizes.
# --------------------------------------------------------------------------
def attn_kernel(q_ref, k_ref, v_ref, o_ref, *, scale):
    q = q_ref[0].astype(jnp.float32)              # (H, tq, D)
    k = k_ref[0].astype(jnp.float32)              # (H, Nk, D)
    v = v_ref[0].astype(jnp.float32)              # (H, Nk, D)

    s = jnp.einsum("hqd,hkd->hqk", q, k,
                   preferred_element_type=jnp.float32) * scale
    m = jnp.max(s, axis=-1, keepdims=True)
    p = jnp.exp(s - m)
    denom = jnp.sum(p, axis=-1, keepdims=True)
    p = p * pl.reciprocal(denom, approx=True)      # softmax(dim=-1), EUP recip
    # nn.Dropout(attn) is identity at inference.
    o_ref[0] = jnp.einsum("hqk,hkd->hqd", p, v,
                          preferred_element_type=jnp.float32)


def attention(q, k, v, scale, *, tq=256):
    B, H, Nq, D = q.shape
    Nk = k.shape[2]
    tq = min(tq, Nq)
    kern = functools.partial(attn_kernel, scale=scale)
    return pl.pallas_call(
        kern,
        out_shape=jax.ShapeDtypeStruct((B, H, Nq, D), jnp.float32),
        grid=(B, pl.cdiv(Nq, tq)),
        in_specs=[
            pl.BlockSpec((1, H, tq, D), lambda b, i: (b, 0, i, 0)),
            pl.BlockSpec((1, H, Nk, D), lambda b, i: (b, 0, 0, 0)),  # resident over i
            pl.BlockSpec((1, H, Nk, D), lambda b, i: (b, 0, 0, 0)),  # resident over i
        ],
        out_specs=pl.BlockSpec((1, H, tq, D), lambda b, i: (b, 0, i, 0)),
        compiler_params=pltpu.CompilerParams(
            dimension_semantics=("parallel", "parallel"),
            vmem_limit_bytes=32 * 1024 * 1024,
        ),
    )(q, k, v)


# --------------------------------------------------------------------------
# Static weight quantization (BitNet b1.58 ternary) -- done ONCE, not per call.
# --------------------------------------------------------------------------
def _weight_quant(w):
    w = w.astype(jnp.float32)
    s = 1.0 / jnp.maximum(jnp.mean(jnp.abs(w)), 1e-5)
    return jnp.clip(jnp.round(w * s), -1.0, 1.0) / s


def quantize_params(params):
    wq = _weight_quant(params["wq"])
    wk = _weight_quant(params["wk"])
    wv = _weight_quant(params["wv"])
    wo = _weight_quant(params["wo"])
    # k and v share the same BitLinear input (context), so their (already
    # individually quantized) weights are fused into one matmul with a
    # lane-dense 2*inner output.
    return {
        "wq_q": wq,                                   # (inner, dim)
        "wq_kv": jnp.concatenate([wk, wv], axis=0),   # (2*inner, dim)
        "wq_o": wo,                                   # (dim, inner)
    }


# --------------------------------------------------------------------------
# Module wrapper
# --------------------------------------------------------------------------
def multimodal_cross_attention(x, context, qparams, *, heads, dim_head):
    B, Nx, dim = x.shape
    _, Nc, _ = context.shape
    inner = heads * dim_head
    scale = dim_head ** (-0.5)

    q = bitlinear(x.reshape(B * Nx, dim), qparams["wq_q"]).reshape(B, Nx, inner)
    kv = bitlinear(context.reshape(B * Nc, dim), qparams["wq_kv"])
    kv = kv.reshape(B, Nc, 2 * inner)
    k, v = kv[..., :inner], kv[..., inner:]

    # rearrange 'b n (h d) -> b h n d'
    def split_heads(t, n):
        return t.reshape(B, n, heads, dim_head).transpose(0, 2, 1, 3)

    qh, kh, vh = split_heads(q, Nx), split_heads(k, Nc), split_heads(v, Nc)

    out = attention(qh, kh, vh, scale)                       # (B, H, Nx, D)

    # rearrange 'b h n d -> b n (h d)'
    out = out.transpose(0, 2, 1, 3).reshape(B, Nx, inner)

    # to_out = BitLinear(inner, dim) + Dropout (identity at inference)
    out = bitlinear(out.reshape(B * Nx, inner), qparams["wq_o"]).reshape(B, Nx, dim)
    return out


def init_params(key, dim, heads, dim_head):
    inner = heads * dim_head
    k1, k2, k3, k4 = jax.random.split(key, 4)
    std = 0.02
    return {
        "wq": jax.random.normal(k1, (inner, dim), jnp.float32) * std,
        "wk": jax.random.normal(k2, (inner, dim), jnp.float32) * std,
        "wv": jax.random.normal(k3, (inner, dim), jnp.float32) * std,
        "wo": jax.random.normal(k4, (dim, inner), jnp.float32) * std,
    }


if __name__ == "__main__":
    # Small, module-consistent shapes: dim=32, heads=4, dim_head=16, seq=8, batch=2.
    B, N, dim = 2, 8, 32
    heads, dim_head = 4, 16

    key = jax.random.PRNGKey(0)
    kx, kc, kp = jax.random.split(key, 3)
    x = jax.random.normal(kx, (B, N, dim), jnp.float32)
    context = jax.random.normal(kc, (B, N, dim), jnp.float32)

    params = init_params(kp, dim, heads, dim_head)
    qparams = quantize_params(params)          # one-time static weight quant

    fwd = jax.jit(functools.partial(multimodal_cross_attention,
                                    heads=heads, dim_head=dim_head))
    out = fwd(x, context, qparams)
    jax.block_until_ready(out)
    assert out.shape == (B, N, dim)
    print("KERNEL_OK")
</pallas_src>

<mosaic_0001>
module attributes {stable_mosaic.version = 11 : i64} {
  func.func @bitlinear_kernel(%arg0: i32, %arg1: i32, %arg2: memref<16x32xf32, #tpu.memory_space<vmem>>, %arg3: memref<64x32xf32, #tpu.memory_space<vmem>>, %arg4: memref<16x64xf32, #tpu.memory_space<vmem>>) attributes {dimension_semantics = [#tpu.dimension_semantics<parallel>, #tpu.dimension_semantics<parallel>], iteration_bounds = array<i64: 1, 1>, scalar_prefetch = 0 : i64, scratch_operands = 0 : i64, tpu.core_type = #tpu.core_type<tc>, window_params = [{transform_indices = @transform_0, window_bounds = array<i64: 16, 32>}, {transform_indices = @transform_1, window_bounds = array<i64: 64, 32>}, {transform_indices = @transform_2, window_bounds = array<i64: 16, 64>}]} {
    %c0 = arith.constant 0 : index
    %c0_0 = arith.constant 0 : index
    %0 = vector.load %arg2[%c0, %c0_0] : memref<16x32xf32, #tpu.memory_space<vmem>>, vector<16x32xf32>
    %c0_1 = arith.constant 0 : index
    %c0_2 = arith.constant 0 : index
    %1 = vector.load %arg3[%c0_1, %c0_2] : memref<64x32xf32, #tpu.memory_space<vmem>>, vector<64x32xf32>
    %2 = arith.mulf %0, %0 : vector<16x32xf32>
    %cst = arith.constant dense<0.000000e+00> : vector<16xf32>
    %3 = vector.multi_reduction <add>, %2, %cst [1] : vector<16x32xf32> to vector<16xf32>
    %4 = vector.shape_cast %3 : vector<16xf32> to vector<16x1xf32>
    %cst_3 = arith.constant 3.200000e+01 : f32
    %5 = vector.broadcast %cst_3 : f32 to vector<16x1xf32>
    %6 = arith.divf %4, %5 : vector<16x1xf32>
    %cst_4 = arith.constant 9.99999997E-7 : f32
    %7 = vector.broadcast %cst_4 : f32 to vector<16x1xf32>
    %8 = arith.addf %6, %7 : vector<16x1xf32>
    %9 = math.rsqrt %8 : vector<16x1xf32>
    %10 = vector.broadcast %9 : vector<16x1xf32> to vector<16x32xf32>
    %11 = arith.mulf %0, %10 : vector<16x32xf32>
    %12 = math.absf %11 : vector<16x32xf32>
    %cst_5 = arith.constant dense<0xFF800000> : vector<16xf32>
    %13 = vector.multi_reduction <maximumf>, %12, %cst_5 [1] : vector<16x32xf32> to vector<16xf32>
    %14 = vector.shape_cast %13 : vector<16xf32> to vector<16x1xf32>
    %cst_6 = arith.constant 9.99999974E-6 : f32
    %15 = vector.broadcast %cst_6 : f32 to vector<16x1xf32>
    %16 = arith.maximumf %14, %15 : vector<16x1xf32>
    %17 = tpu.reciprocal %16 {approx = true} : vector<16x1xf32> -> vector<16x1xf32>
    %cst_7 = arith.constant 1.270000e+02 : f32
    %18 = vector.broadcast %cst_7 : f32 to vector<16x1xf32>
    %19 = arith.mulf %18, %17 : vector<16x1xf32>
    %cst_8 = arith.constant 0.00787401571 : f32
    %20 = vector.broadcast %cst_8 : f32 to vector<16x1xf32>
    %21 = arith.mulf %16, %20 : vector<16x1xf32>
    %22 = vector.broadcast %19 : vector<16x1xf32> to vector<16x32xf32>
    %23 = arith.mulf %11, %22 : vector<16x32xf32>
    %24 = math.roundeven %23 : vector<16x32xf32>
    %cst_9 = arith.constant -1.280000e+02 : f32
    %cst_10 = arith.constant 1.270000e+02 : f32
    %25 = vector.broadcast %cst_9 : f32 to vector<16x32xf32>
    %26 = arith.maximumf %25, %24 : vector<16x32xf32>
    %27 = vector.broadcast %cst_10 : f32 to vector<16x32xf32>
    %28 = arith.minimumf %27, %26 : vector<16x32xf32>
    %29 = vector.broadcast %21 : vector<16x1xf32> to vector<16x32xf32>
    %30 = arith.mulf %28, %29 : vector<16x32xf32>
    %cst_11 = arith.constant dense<0.000000e+00> : vector<16x64xf32>
    %31 = tpu.matmul %30, %1, %cst_11 {dimension_numbers = #tpu.dot_dimension_numbers<[1], [1], [0], [0], [0, 0, 1, 0], [], []>} : vector<16x32xf32>, vector<64x32xf32>, vector<16x64xf32> -> vector<16x64xf32>
    %c0_12 = arith.constant 0 : index
    %c0_13 = arith.constant 0 : index
    %32 = vector.load %arg4[%c0_12, %c0_13] : memref<16x64xf32, #tpu.memory_space<vmem>>, vector<16x64xf32>
    tpu.vector_store %arg4[%c0_12, %c0_13], %31 {strides = array<i32>} : memref<16x64xf32, #tpu.memory_space<vmem>>, vector<16x64xf32>,
    return
  }
  func.func @transform_0(%arg0: i32, %arg1: i32) -> (i32, i32) {
    %c0_i32 = arith.constant 0 : i32
    %c0_i32_0 = arith.constant 0 : i32
    return %arg0, %c0_i32 : i32, i32
  }
  func.func @transform_1(%arg0: i32, %arg1: i32) -> (i32, i32) {
    %c0_i32 = arith.constant 0 : i32
    %c0_i32_0 = arith.constant 0 : i32
    return %arg1, %c0_i32 : i32, i32
  }
  func.func @transform_2(%arg0: i32, %arg1: i32) -> (i32, i32) {
    %c0_i32 = arith.constant 0 : i32
    return %arg0, %arg1 : i32, i32
  }
}

module attributes {stable_mosaic.version = 11 : i64} {
  func.func @bitlinear_kernel(%arg0: i32, %arg1: i32, %arg2: memref<16x32xf32, #tpu.memory_space<vmem>>, %arg3: memref<128x32xf32, #tpu.memory_space<vmem>>, %arg4: memref<16x128xf32, #tpu.memory_space<vmem>>) attributes {dimension_semantics = [#tpu.dimension_semantics<parallel>, #tpu.dimension_semantics<parallel>], iteration_bounds = array<i64: 1, 1>, scalar_prefetch = 0 : i64, scratch_operands = 0 : i64, tpu.core_type = #tpu.core_type<tc>, window_params = [{transform_indices = @transform_0, window_bounds = array<i64: 16, 32>}, {transform_indices = @transform_1, window_bounds = array<i64: 128, 32>}, {transform_indices = @transform_2, window_bounds = array<i64: 16, 128>}]} {
    %c0 = arith.constant 0 : index
    %c0_0 = arith.constant 0 : index
    %0 = vector.load %arg2[%c0, %c0_0] : memref<16x32xf32, #tpu.memory_space<vmem>>, vector<16x32xf32>
    %c0_1 = arith.constant 0 : index
    %c0_2 = arith.constant 0 : index
    %1 = vector.load %arg3[%c0_1, %c0_2] : memref<128x32xf32, #tpu.memory_space<vmem>>, vector<128x32xf32>
    %2 = arith.mulf %0, %0 : vector<16x32xf32>
    %cst = arith.constant dense<0.000000e+00> : vector<16xf32>
    %3 = vector.multi_reduction <add>, %2, %cst [1] : vector<16x32xf32> to vector<16xf32>
    %4 = vector.shape_cast %3 : vector<16xf32> to vector<16x1xf32>
    %cst_3 = arith.constant 3.200000e+01 : f32
    %5 = vector.broadcast %cst_3 : f32 to vector<16x1xf32>
    %6 = arith.divf %4, %5 : vector<16x1xf32>
    %cst_4 = arith.constant 9.99999997E-7 : f32
    %7 = vector.broadcast %cst_4 : f32 to vector<16x1xf32>
    %8 = arith.addf %6, %7 : vector<16x1xf32>
    %9 = math.rsqrt %8 : vector<16x1xf32>
    %10 = vector.broadcast %9 : vector<16x1xf32> to vector<16x32xf32>
    %11 = arith.mulf %0, %10 : vector<16x32xf32>
    %12 = math.absf %11 : vector<16x32xf32>
    %cst_5 = arith.constant dense<0xFF800000> : vector<16xf32>
    %13 = vector.multi_reduction <maximumf>, %12, %cst_5 [1] : vector<16x32xf32> to vector<16xf32>
    %14 = vector.shape_cast %13 : vector<16xf32> to vector<16x1xf32>
    %cst_6 = arith.constant 9.99999974E-6 : f32
    %15 = vector.broadcast %cst_6 : f32 to vector<16x1xf32>
    %16 = arith.maximumf %14, %15 : vector<16x1xf32>
    %17 = tpu.reciprocal %16 {approx = true} : vector<16x1xf32> -> vector<16x1xf32>
    %cst_7 = arith.constant 1.270000e+02 : f32
    %18 = vector.broadcast %cst_7 : f32 to vector<16x1xf32>
    %19 = arith.mulf %18, %17 : vector<16x1xf32>
    %cst_8 = arith.constant 0.00787401571 : f32
    %20 = vector.broadcast %cst_8 : f32 to vector<16x1xf32>
    %21 = arith.mulf %16, %20 : vector<16x1xf32>
    %22 = vector.broadcast %19 : vector<16x1xf32> to vector<16x32xf32>
    %23 = arith.mulf %11, %22 : vector<16x32xf32>
    %24 = math.roundeven %23 : vector<16x32xf32>
    %cst_9 = arith.constant -1.280000e+02 : f32
    %cst_10 = arith.constant 1.270000e+02 : f32
    %25 = vector.broadcast %cst_9 : f32 to vector<16x32xf32>
    %26 = arith.maximumf %25, %24 : vector<16x32xf32>
    %27 = vector.broadcast %cst_10 : f32 to vector<16x32xf32>
    %28 = arith.minimumf %27, %26 : vector<16x32xf32>
    %29 = vector.broadcast %21 : vector<16x1xf32> to vector<16x32xf32>
    %30 = arith.mulf %28, %29 : vector<16x32xf32>
    %cst_11 = arith.constant dense<0.000000e+00> : vector<16x128xf32>
    %31 = tpu.matmul %30, %1, %cst_11 {dimension_numbers = #tpu.dot_dimension_numbers<[1], [1], [0], [0], [0, 0, 1, 0], [], []>} : vector<16x32xf32>, vector<128x32xf32>, vector<16x128xf32> -> vector<16x128xf32>
    %c0_12 = arith.constant 0 : index
    %c0_13 = arith.constant 0 : index
    %32 = vector.load %arg4[%c0_12, %c0_13] : memref<16x128xf32, #tpu.memory_space<vmem>>, vector<16x128xf32>
    tpu.vector_store %arg4[%c0_12, %c0_13], %31 {strides = array<i32>} : memref<16x128xf32, #tpu.memory_space<vmem>>, vector<16x128xf32>,
    return
  }
  func.func @transform_0(%arg0: i32, %arg1: i32) -> (i32, i32) {
    %c0_i32 = arith.constant 0 : i32
    %c0_i32_0 = arith.constant 0 : i32
    return %arg0, %c0_i32 : i32, i32
  }
  func.func @transform_1(%arg0: i32, %arg1: i32) -> (i32, i32) {
    %c0_i32 = arith.constant 0 : i32
    %c0_i32_0 = arith.constant 0 : i32
    return %arg1, %c0_i32 : i32, i32
  }
  func.func @transform_2(%arg0: i32, %arg1: i32) -> (i32, i32) {
    %c0_i32 = arith.constant 0 : i32
    return %arg0, %arg1 : i32, i32
  }
}

module attributes {stable_mosaic.version = 11 : i64} {
  func.func @attn_kernel(%arg0: i32, %arg1: i32, %arg2: memref<1x4x8x16xf32, #tpu.memory_space<vmem>>, %arg3: memref<1x4x8x16xf32, #tpu.memory_space<vmem>>, %arg4: memref<1x4x8x16xf32, #tpu.memory_space<vmem>>, %arg5: memref<1x4x8x16xf32, #tpu.memory_space<vmem>>) attributes {dimension_semantics = [#tpu.dimension_semantics<parallel>, #tpu.dimension_semantics<parallel>], iteration_bounds = array<i64: 2, 1>, scalar_prefetch = 0 : i64, scratch_operands = 0 : i64, tpu.core_type = #tpu.core_type<tc>, window_params = [{transform_indices = @transform_0, window_bounds = array<i64: 1, 4, 8, 16>}, {transform_indices = @transform_1, window_bounds = array<i64: 1, 4, 8, 16>}, {transform_indices = @transform_2, window_bounds = array<i64: 1, 4, 8, 16>}, {transform_indices = @transform_3, window_bounds = array<i64: 1, 4, 8, 16>}]} {
    %c0 = arith.constant 0 : index
    %c0_0 = arith.constant 0 : index
    %c0_1 = arith.constant 0 : index
    %c0_2 = arith.constant 0 : index
    %0 = vector.load %arg2[%c0, %c0_0, %c0_1, %c0_2] : memref<1x4x8x16xf32, #tpu.memory_space<vmem>>, vector<1x4x8x16xf32>
    %1 = vector.shape_cast %0 : vector<1x4x8x16xf32> to vector<4x8x16xf32>
    %c0_3 = arith.constant 0 : index
    %c0_4 = arith.constant 0 : index
    %c0_5 = arith.constant 0 : index
    %c0_6 = arith.constant 0 : index
    %2 = vector.load %arg3[%c0_3, %c0_4, %c0_5, %c0_6] : memref<1x4x8x16xf32, #tpu.memory_space<vmem>>, vector<1x4x8x16xf32>
    %3 = vector.shape_cast %2 : vector<1x4x8x16xf32> to vector<4x8x16xf32>
    %c0_7 = arith.constant 0 : index
    %c0_8 = arith.constant 0 : index
    %c0_9 = arith.constant 0 : index
    %c0_10 = arith.constant 0 : index
    %4 = vector.load %arg4[%c0_7, %c0_8, %c0_9, %c0_10] : memref<1x4x8x16xf32, #tpu.memory_space<vmem>>, vector<1x4x8x16xf32>
    %5 = vector.shape_cast %4 : vector<1x4x8x16xf32> to vector<4x8x16xf32>
    "tpu.trace_start"() <{level = 10 : i32, message = "hqd,hkd->hqk"}> : () -> ()
    %cst = arith.constant dense<0.000000e+00> : vector<4x8x8xf32>
    %6 = tpu.matmul %1, %3, %cst {dimension_numbers = #tpu.dot_dimension_numbers<[2], [2], [1], [1], [0, 0, 0, 1, 1, 1], [0], [0]>} : vector<4x8x16xf32>, vector<4x8x16xf32>, vector<4x8x8xf32> -> vector<4x8x8xf32>
    "tpu.trace_stop"() : () -> ()
    %cst_11 = arith.constant 2.500000e-01 : f32
    %7 = vector.broadcast %cst_11 : f32 to vector<4x8x8xf32>
    %8 = arith.mulf %6, %7 : vector<4x8x8xf32>
    %cst_12 = arith.constant dense<0xFF800000> : vector<4x8xf32>
    %9 = vector.multi_reduction <maximumf>, %8, %cst_12 [2] : vector<4x8x8xf32> to vector<4x8xf32>
    %10 = vector.shape_cast %9 : vector<4x8xf32> to vector<4x8x1xf32>
    %11 = vector.broadcast %10 : vector<4x8x1xf32> to vector<4x8x8xf32>
    %12 = arith.subf %8, %11 : vector<4x8x8xf32>
    %13 = math.exp %12 : vector<4x8x8xf32>
    %cst_13 = arith.constant dense<0.000000e+00> : vector<4x8xf32>
    %14 = vector.multi_reduction <add>, %13, %cst_13 [2] : vector<4x8x8xf32> to vector<4x8xf32>
    %15 = vector.shape_cast %14 : vector<4x8xf32> to vector<4x8x1xf32>
    %16 = tpu.reciprocal %15 {approx = true} : vector<4x8x1xf32> -> vector<4x8x1xf32>
    %17 = vector.broadcast %16 : vector<4x8x1xf32> to vector<4x8x8xf32>
    %18 = arith.mulf %13, %17 : vector<4x8x8xf32>
    "tpu.trace_start"() <{level = 10 : i32, message = "hqk,hkd->hqd"}> : () -> ()
    %cst_14 = arith.constant dense<0.000000e+00> : vector<4x8x16xf32>
    %19 = tpu.matmul %18, %5, %cst_14 {dimension_numbers = #tpu.dot_dimension_numbers<[2], [1], [1], [2], [0, 0, 0, 1, 1, 2], [0], [0]>} : vector<4x8x8xf32>, vector<4x8x16xf32>, vector<4x8x16xf32> -> vector<4x8x16xf32>
    "tpu.trace_stop"() : () -> ()
    %c0_15 = arith.constant 0 : index
    %c0_16 = arith.constant 0 : index
    %c0_17 = arith.constant 0 : index
    %c0_18 = arith.constant 0 : index
    %20 = vector.load %arg5[%c0_15, %c0_16, %c0_17, %c0_18] : memref<1x4x8x16xf32, #tpu.memory_space<vmem>>, vector<1x4x8x16xf32>
    %21 = vector.shape_cast %20 : vector<1x4x8x16xf32> to vector<4x8x16xf32>
    %22 = vector.shape_cast %19 : vector<4x8x16xf32> to vector<1x4x8x16xf32>
    tpu.vector_store %arg5[%c0_15, %c0_16, %c0_17, %c0_18], %22 {strides = array<i32>} : memref<1x4x8x16xf32, #tpu.memory_space<vmem>>, vector<1x4x8x16xf32>,
    return
  }
  func.func @transform_0(%arg0: i32, %arg1: i32) -> (i32, i32, i32, i32) {
    %c0_i32 = arith.constant 0 : i32
    %c0_i32_0 = arith.constant 0 : i32
    %c0_i32_1 = arith.constant 0 : i32
    return %arg0, %c0_i32, %arg1, %c0_i32_0 : i32, i32, i32, i32
  }
  func.func @transform_1(%arg0: i32, %arg1: i32) -> (i32, i32, i32, i32) {
    %c0_i32 = arith.constant 0 : i32
    %c0_i32_0 = arith.constant 0 : i32
    %c0_i32_1 = arith.constant 0 : i32
    %c0_i32_2 = arith.constant 0 : i32
    return %arg0, %c0_i32, %c0_i32_0, %c0_i32_1 : i32, i32, i32, i32
  }
  func.func @transform_2(%arg0: i32, %arg1: i32) -> (i32, i32, i32, i32) {
    %c0_i32 = arith.constant 0 : i32
    %c0_i32_0 = arith.constant 0 : i32
    %c0_i32_1 = arith.constant 0 : i32
    %c0_i32_2 = arith.constant 0 : i32
    return %arg0, %c0_i32, %c0_i32_0, %c0_i32_1 : i32, i32, i32, i32
  }
  func.func @transform_3(%arg0: i32, %arg1: i32) -> (i32, i32, i32, i32) {
    %c0_i32 = arith.constant 0 : i32
    %c0_i32_0 = arith.constant 0 : i32
    %c0_i32_1 = arith.constant 0 : i32
    return %arg0, %c0_i32, %arg1, %c0_i32_0 : i32, i32, i32, i32
  }
}

module attributes {stable_mosaic.version = 11 : i64} {
  func.func @bitlinear_kernel(%arg0: i32, %arg1: i32, %arg2: memref<16x64xf32, #tpu.memory_space<vmem>>, %arg3: memref<32x64xf32, #tpu.memory_space<vmem>>, %arg4: memref<16x32xf32, #tpu.memory_space<vmem>>) attributes {dimension_semantics = [#tpu.dimension_semantics<parallel>, #tpu.dimension_semantics<parallel>], iteration_bounds = array<i64: 1, 1>, scalar_prefetch = 0 : i64, scratch_operands = 0 : i64, tpu.core_type = #tpu.core_type<tc>, window_params = [{transform_indices = @transform_0, window_bounds = array<i64: 16, 64>}, {transform_indices = @transform_1, window_bounds = array<i64: 32, 64>}, {transform_indices = @transform_2, window_bounds = array<i64: 16, 32>}]} {
    %c0 = arith.constant 0 : index
    %c0_0 = arith.constant 0 : index
    %0 = vector.load %arg2[%c0, %c0_0] : memref<16x64xf32, #tpu.memory_space<vmem>>, vector<16x64xf32>
    %c0_1 = arith.constant 0 : index
    %c0_2 = arith.constant 0 : index
    %1 = vector.load %arg3[%c0_1, %c0_2] : memref<32x64xf32, #tpu.memory_space<vmem>>, vector<32x64xf32>
    %2 = arith.mulf %0, %0 : vector<16x64xf32>
    %cst = arith.constant dense<0.000000e+00> : vector<16xf32>
    %3 = vector.multi_reduction <add>, %2, %cst [1] : vector<16x64xf32> to vector<16xf32>
    %4 = vector.shape_cast %3 : vector<16xf32> to vector<16x1xf32>
    %cst_3 = arith.constant 6.400000e+01 : f32
    %5 = vector.broadcast %cst_3 : f32 to vector<16x1xf32>
    %6 = arith.divf %4, %5 : vector<16x1xf32>
    %cst_4 = arith.constant 9.99999997E-7 : f32
    %7 = vector.broadcast %cst_4 : f32 to vector<16x1xf32>
    %8 = arith.addf %6, %7 : vector<16x1xf32>
    %9 = math.rsqrt %8 : vector<16x1xf32>
    %10 = vector.broadcast %9 : vector<16x1xf32> to vector<16x64xf32>
    %11 = arith.mulf %0, %10 : vector<16x64xf32>
    %12 = math.absf %11 : vector<16x64xf32>
    %cst_5 = arith.constant dense<0xFF800000> : vector<16xf32>
    %13 = vector.multi_reduction <maximumf>, %12, %cst_5 [1] : vector<16x64xf32> to vector<16xf32>
    %14 = vector.shape_cast %13 : vector<16xf32> to vector<16x1xf32>
    %cst_6 = arith.constant 9.99999974E-6 : f32
    %15 = vector.broadcast %cst_6 : f32 to vector<16x1xf32>
    %16 = arith.maximumf %14, %15 : vector<16x1xf32>
    %17 = tpu.reciprocal %16 {approx = true} : vector<16x1xf32> -> vector<16x1xf32>
    %cst_7 = arith.constant 1.270000e+02 : f32
    %18 = vector.broadcast %cst_7 : f32 to vector<16x1xf32>
    %19 = arith.mulf %18, %17 : vector<16x1xf32>
    %cst_8 = arith.constant 0.00787401571 : f32
    %20 = vector.broadcast %cst_8 : f32 to vector<16x1xf32>
    %21 = arith.mulf %16, %20 : vector<16x1xf32>
    %22 = vector.broadcast %19 : vector<16x1xf32> to vector<16x64xf32>
    %23 = arith.mulf %11, %22 : vector<16x64xf32>
    %24 = math.roundeven %23 : vector<16x64xf32>
    %cst_9 = arith.constant -1.280000e+02 : f32
    %cst_10 = arith.constant 1.270000e+02 : f32
    %25 = vector.broadcast %cst_9 : f32 to vector<16x64xf32>
    %26 = arith.maximumf %25, %24 : vector<16x64xf32>
    %27 = vector.broadcast %cst_10 : f32 to vector<16x64xf32>
    %28 = arith.minimumf %27, %26 : vector<16x64xf32>
    %29 = vector.broadcast %21 : vector<16x1xf32> to vector<16x64xf32>
    %30 = arith.mulf %28, %29 : vector<16x64xf32>
    %cst_11 = arith.constant dense<0.000000e+00> : vector<16x32xf32>
    %31 = tpu.matmul %30, %1, %cst_11 {dimension_numbers = #tpu.dot_dimension_numbers<[1], [1], [0], [0], [0, 0, 1, 0], [], []>} : vector<16x64xf32>, vector<32x64xf32>, vector<16x32xf32> -> vector<16x32xf32>
    %c0_12 = arith.constant 0 : index
    %c0_13 = arith.constant 0 : index
    %32 = vector.load %arg4[%c0_12, %c0_13] : memref<16x32xf32, #tpu.memory_space<vmem>>, vector<16x32xf32>
    tpu.vector_store %arg4[%c0_12, %c0_13], %31 {strides = array<i32>} : memref<16x32xf32, #tpu.memory_space<vmem>>, vector<16x32xf32>,
    return
  }
  func.func @transform_0(%arg0: i32, %arg1: i32) -> (i32, i32) {
    %c0_i32 = arith.constant 0 : i32
    %c0_i32_0 = arith.constant 0 : i32
    return %arg0, %c0_i32 : i32, i32
  }
  func.func @transform_1(%arg0: i32, %arg1: i32) -> (i32, i32) {
    %c0_i32 = arith.constant 0 : i32
    %c0_i32_0 = arith.constant 0 : i32
    return %arg1, %c0_i32 : i32, i32
  }
  func.func @transform_2(%arg0: i32, %arg1: i32) -> (i32, i32) {
    %c0_i32 = arith.constant 0 : i32
    return %arg0, %arg1 : i32, i32
  }
}

</mosaic_0001>

<bundles_post_ra>
// kernel: multimodal_cross_attention.4
= control target key start
LH: loop header
LB: loop body
LE: loop exit
PB: predicated region body
PF: predicated region fallthrough
CT: control target
= control target key end

     0   :  { %vm23_vm0 = vcmask 261120   ;;  %v194_v6 = vmov 32.0   ;;  %vm142_vm10 = vcmask 523264   ;;  %s268_s0 = inlined_call_operand.vmem [shape: f32[16,32], index: 0, kind: input, shape index: {}]   ;;  %s269_s1 = inlined_call_operand.vmem [shape: f32[64,32], index: 1, kind: input, shape index: {}]   ;;  %s270_s2 = inlined_call_operand.vmem [shape: f32[16,64], index: 2, kind: output, shape index: {}]  }
   0x1   :  { %v11_v0 = vld [vmem:[%s268_s0] sm:$0xff]  ;;  %v12_v2 = vld [vmem:[%s268_s0 + $0x8] sm:$0xff]  ;;  %184 = vrcp.f32 %v194_v6  ;;  %v20_v16 = vld [vmem:[%s269_s1 + $0x38] sm:$0xff] }
   0x2   :  { %v21_v1 = vmul.f32 %v11_v0, %v11_v0  ;;  %v22_v4 = vmul.f32 %v12_v2, %v12_v2  ;;  %149 = vmatpush.xpose.msk.msra.mxu0 %vm23_vm0, %v20_v16  ;;  %159 = vmatpush.xpose.msk.msra.mxu1 %vm23_vm0, %v20_v16  ;;  %v19_v40 = vld [vmem:[%s269_s1 + $0x30] sm:$0xff]  ;;  %v18_v41 = vld [vmem:[%s269_s1 + $0x28] sm:$0xff]  ;;  %v17_v42 = vld [vmem:[%s269_s1 + $0x20] sm:$0xff] }
   0x3   :  { %v16_v43 = vld [vmem:[%s269_s1 + $0x18] sm:$0xff]  ;;  %v15_v44 = vld [vmem:[%s269_s1 + $0x10] sm:$0xff]  ;;  %v14_v45 = vld [vmem:[%s269_s1 + $0x8] sm:$0xff] }
   0x4   :  { %v24_v3 = vsel %vm23_vm0, %v21_v1, 0.0  ;;  %v27_v5 = vsel %vm23_vm0, %v22_v4, 0.0  ;;  %v13_v46 = vld [vmem:[%s269_s1] sm:$0xff] }
   0x5   :  { %25 = vadd.xlane.f32.xlu0 %v24_v3 }
   0x6   :  { %150 = vmatpush.xpose.msk.msra.mxu0 %vm23_vm0, %v19_v40  ;;  %160 = vmatpush.xpose.msk.msra.mxu1 %vm23_vm0, %v19_v40 }
   0x7   :  { %v185_v7 = vpop.eup %184 }
   0x8   :  { %v31_v8 = vmul.f32 32.0, %v185_v7  ;;  %vm35_vm1 = vweird.f32 %v185_v7 }
   0xa   :  { %v32_v9 = vsub.f32 1.0, %v31_v8  ;;  %151 = vmatpush.xpose.msk.msra.mxu0 %vm23_vm0, %v18_v41  ;;  %161 = vmatpush.xpose.msk.msra.mxu1 %vm23_vm0, %v18_v41 }
   0xc   :  { %v33_v10 = vmul.f32 %v185_v7, %v32_v9 }
   0xd   :  { %28 = vadd.xlane.f32.xlu0 %v27_v5 }
   0xe   :  { %v34_v11 = vadd.f32 %v185_v7, %v33_v10  ;;  %152 = vmatpush.xpose.msk.msra.mxu0 %vm23_vm0, %v17_v42  ;;  %162 = vmatpush.xpose.msk.msra.mxu1 %vm23_vm0, %v17_v42 }
  0x10   :  { %v36_v12 = vsel %vm35_vm1, %v185_v7, %v34_v11 }
  0x12   :  { %153 = vmatpush.xpose.msk.msra.mxu0 %vm23_vm0, %v16_v43  ;;  %163 = vmatpush.xpose.msk.msra.mxu1 %vm23_vm0, %v16_v43 }
  0x16   :  { %154 = vmatpush.xpose.msk.msra.mxu0 %vm23_vm0, %v15_v44  ;;  %164 = vmatpush.xpose.msk.msra.mxu1 %vm23_vm0, %v15_v44 }
  0x1a   :  { %155 = vmatpush.xpose.msk.msra.mxu0 %vm23_vm0, %v14_v45  ;;  %165 = vmatpush.xpose.msk.msra.mxu1 %vm23_vm0, %v14_v45 }
  0x1e   :  { %156 = vmatpush.xpose.msk.msra.mxu0 %vm23_vm0, %v13_v46  ;;  %166 = vmatpush.xpose.msk.msra.mxu1 %vm23_vm0, %v13_v46 }
  0x78   :  { %v26_v13 = vpop.xlane.xlu0 %25 }
  0x79   :  { %v37_v14 = vmul.f32 %v36_v12, %v26_v13 }
  0x7b   :  { %v39_v15 = vadd.f32 1e-06, %v37_v14 }
  0x7d   :  { %186 = vrsqrt.f32 %v39_v15  ;;  %vm47_vm3 = vweird.f32 %v39_v15 }
  0x80   :  { %v29_v17 = vpop.xlane.xlu0 %28 }
  0x81   :  { %v38_v18 = vmul.f32 %v36_v12, %v29_v17 }
  0x83   :  { %v187_v19 = vpop.eup %186  ;;  %v40_v20 = vadd.f32 1e-06, %v38_v18 }
  0x84   :  { %v42_v21 = vmul.f32 %v187_v19, %v39_v15  ;;  %vm48_vm2 = vweird.f32 %v187_v19 }
  0x85   :  { %188 = vrsqrt.f32 %v40_v20  ;;  %vm49_vm4 = vmor %vm47_vm3, %vm48_vm2  ;;  %vm57_vm6 = vweird.f32 %v40_v20 }
  0x86   :  { %v43_v22 = vmul.f32 %v187_v19, %v42_v21 }
  0x88   :  { %v44_v23 = vmul.f32 0.5, %v43_v22 }
  0x8a   :  { %v45_v24 = vsub.f32 1.5, %v44_v23 }
  0x8b   :  { %v189_v25 = vpop.eup %188 }
  0x8c   :  { %v52_v26 = vmul.f32 %v189_v25, %v40_v20  ;;  %v46_v27 = vmul.f32 %v187_v19, %v45_v24  ;;  %vm58_vm5 = vweird.f32 %v189_v25 }
  0x8d   :  { %vm59_vm7 = vmor %vm57_vm6, %vm58_vm5 }
  0x8e   :  { %v53_v28 = vmul.f32 %v189_v25, %v52_v26  ;;  %v50_v29 = vsel %vm49_vm4, %v187_v19, %v46_v27 }
  0x8f   :  { %v61_v30 = vmul.f32 %v50_v29, %v11_v0 }
  0x90   :  { %v54_v31 = vmul.f32 0.5, %v53_v28 }
  0x91   :  { %v63_v32 = vand.u32 2147483647, %v61_v30 }
  0x92   :  { %v55_v33 = vsub.f32 1.5, %v54_v31 }
  0x93   :  { %v65_v34 = vsel %vm23_vm0, %v63_v32, -inf }
  0x94   :  { %66 = vmax.xlane.f32.xlu1 %v65_v34  ;;  %v56_v35 = vmul.f32 %v189_v25, %v55_v33 }
  0x96   :  { %v60_v36 = vsel %vm59_vm7, %v189_v25, %v56_v35 }
  0x97   :  { %v62_v37 = vmul.f32 %v60_v36, %v12_v2 }
  0x99   :  { %v64_v38 = vand.u32 2147483647, %v62_v37 }
  0x9b   :  { %v68_v39 = vsel %vm23_vm0, %v64_v38, -inf }
  0x9c   :  { %69 = vmax.xlane.f32.xlu1 %v68_v39 }
 0x107   :  { %v67_v47 = vpop.xlane.xlu1 %66 }
 0x108   :  { %v71_v48 = vmax.f32 %v67_v47, 1e-05 }
 0x10a   :  { %190 = vrcp.f32 %v71_v48  ;;  %v77_v3 = vmul.f32 0.007874016, %v71_v48 }
 0x10f   :  { %v70_v49 = vpop.xlane.xlu1 %69 }
 0x110   :  { %v191_v50 = vpop.eup %190  ;;  %v72_v51 = vmax.f32 %v70_v49, 1e-05 }
 0x111   :  { %v75_v52 = vmul.f32 127.0, %v191_v50 }
 0x112   :  { %192 = vrcp.f32 %v72_v51  ;;  %v78_v12 = vmul.f32 0.007874016, %v72_v51 }
 0x113   :  { %v79_v53 = vmul.f32 %v75_v52, %v61_v30 }
 0x115   :  { %v169_v54 = vcvt.f32.s32 %v79_v53  ;;  %v167_v57 = vand.u32 2147483647, %v79_v53  ;;  %v172_v60 = vand.u32 2147483648, %v79_v53 }
 0x117   :  { %v170_v55 = vcvt.s32.f32 %v169_v54  ;;  %vm168_vm8 = vcmp.lt.f32.partialorder %v167_v57, 8388608.0 }
 0x118   :  { %v193_v56 = vpop.eup %192 }
 0x119   :  { %v76_v58 = vmul.f32 127.0, %v193_v56  ;;  %v171_v59 = vand.u32 2147483647, %v170_v55 }
 0x11b   :  { %v80_v61 = vmul.f32 %v76_v58, %v62_v37  ;;  %v173_v62 = vor.u32 %v172_v60, %v171_v59 }
 0x11d   :  { %v177_v63 = vcvt.f32.s32 %v80_v61  ;;  %v174_v0 = vsel %vm168_vm8, %v173_v62, %v79_v53  ;;  %v175_v4 = vand.u32 2147483647, %v80_v61  ;;  %v180_v7 = vand.u32 2147483648, %v80_v61 }
 0x11e   :  { %v83_v1 = vmax.f32 %v174_v0, -128.0 }
 0x11f   :  { %v178_v2 = vcvt.s32.f32 %v177_v63  ;;  %vm176_vm9 = vcmp.lt.f32.partialorder %v175_v4, 8388608.0 }
 0x120   :  { %v85_v5 = vmin.f32 %v83_v1, 127.0 }
 0x121   :  { %v179_v6 = vand.u32 2147483647, %v178_v2 }
 0x122   :  { %v87_v8 = vmul.f32 %v85_v5, %v77_v3 }
 0x123   :  { %v181_v9 = vor.u32 %v180_v7, %v179_v6 }
 0x124   :  { %157 = vmatmul.msk.f32.vlgmr.msra.gmra.mxu0 %vm23_vm0, %v87_v8 }
 0x125   :  { %v182_v10 = vsel %vm176_vm9, %v181_v9, %v80_v61 }
 0x126   :  { %v84_v11 = vmax.f32 %v182_v10, -128.0 }
 0x128   :  { %v86_v13 = vmin.f32 %v84_v11, 127.0 }
 0x12a   :  { %v88_v14 = vmul.f32 %v86_v13, %v78_v12 }
 0x12c   :  { %158 = vmatmul.msk.f32.vlgmr.msra.gmra.mxu1 %vm23_vm0, %v88_v14 }
 0x1a1   :  { %v136_v15 = vpop.f32.mrf.mxu0 }
 0x1a2   :  { %143 = vst.msk [vmem:[%s270_s2] sm:$0xff] %vm142_vm10, %v136_v15 }
 0x1a9   :  { %v139_v16 = vpop.f32.mrf.mxu1 }
 0x1aa   :  { %144 = vst.msk [vmem:[%s270_s2 + $0x8] sm:$0xff] %vm142_vm10, %v139_v16 }

// kernel: multimodal_cross_attention.5
= control target key start
LH: loop header
LB: loop body
LE: loop exit
PB: predicated region body
PF: predicated region fallthrough
CT: control target
= control target key end

     0   :  { %vm31_vm0 = vcmask 261120   ;;  %v241_v6 = vmov 32.0   ;;  %s360_s0 = inlined_call_operand.vmem [shape: f32[16,32], index: 0, kind: input, shape index: {}]   ;;  %s361_s1 = inlined_call_operand.vmem [shape: f32[128,32], index: 1, kind: input, shape index: {}]   ;;  %s362_s2 = inlined_call_operand.vmem [shape: f32[16,128], index: 2, kind: output, shape index: {}]  }
   0x1   :  { %v11_v0 = vld [vmem:[%s360_s0] sm:$0xff]  ;;  %v263_v2 = vld [vmem:[%s360_s0 + $0x8] sm:$0xff]  ;;  %231 = vrcp.f32 %v241_v6  ;;  %v28_v16 = vld [vmem:[%s361_s1 + $0x78] sm:$0xff] }
   0x2   :  { %v29_v1 = vmul.f32 %v11_v0, %v11_v0  ;;  %v30_v4 = vmul.f32 %v263_v2, %v263_v2  ;;  %180 = vmatpush.xpose.msk.msra.mxu0 %vm31_vm0, %v28_v16  ;;  %198 = vmatpush.xpose.msk.msra.mxu1 %vm31_vm0, %v28_v16  ;;  %v27_v17 = vld [vmem:[%s361_s1 + $0x70] sm:$0xff]  ;;  %v26_v20 = vld [vmem:[%s361_s1 + $0x68] sm:$0xff]  ;;  %v25_v25 = vld [vmem:[%s361_s1 + $0x60] sm:$0xff] }
   0x3   :  { %v24_v28 = vld [vmem:[%s361_s1 + $0x58] sm:$0xff]  ;;  %v23_v34 = vld [vmem:[%s361_s1 + $0x50] sm:$0xff]  ;;  %v22_v39 = vld [vmem:[%s361_s1 + $0x48] sm:$0xff] }
   0x4   :  { %v32_v3 = vsel %vm31_vm0, %v29_v1, 0.0  ;;  %v35_v5 = vsel %vm31_vm0, %v30_v4, 0.0  ;;  %v21_v43 = vld [vmem:[%s361_s1 + $0x40] sm:$0xff]  ;;  %v20_v46 = vld [vmem:[%s361_s1 + $0x38] sm:$0xff]  ;;  %v19_v48 = vld [vmem:[%s361_s1 + $0x30] sm:$0xff] }
   0x5   :  { %33 = vadd.xlane.f32.xlu0 %v32_v3  ;;  %v18_v49 = vld [vmem:[%s361_s1 + $0x28] sm:$0xff]  ;;  %v17_v50 = vld [vmem:[%s361_s1 + $0x20] sm:$0xff]  ;;  %v16_v51 = vld [vmem:[%s361_s1 + $0x18] sm:$0xff] }
   0x6   :  { %181 = vmatpush.xpose.msk.msra.mxu0 %vm31_vm0, %v27_v17  ;;  %199 = vmatpush.xpose.msk.msra.mxu1 %vm31_vm0, %v27_v17  ;;  %v15_v52 = vld [vmem:[%s361_s1 + $0x10] sm:$0xff]  ;;  %v14_v53 = vld [vmem:[%s361_s1 + $0x8] sm:$0xff]  ;;  %v13_v54 = vld [vmem:[%s361_s1] sm:$0xff] }
   0x7   :  { %v232_v7 = vpop.eup %231 }
   0x8   :  { %v39_v8 = vmul.f32 32.0, %v232_v7  ;;  %vm43_vm1 = vweird.f32 %v232_v7 }
   0xa   :  { %v40_v9 = vsub.f32 1.0, %v39_v8  ;;  %182 = vmatpush.xpose.msk.msra.mxu0 %vm31_vm0, %v26_v20  ;;  %200 = vmatpush.xpose.msk.msra.mxu1 %vm31_vm0, %v26_v20 }
   0xc   :  { %v41_v10 = vmul.f32 %v232_v7, %v40_v9 }
   0xd   :  { %36 = vadd.xlane.f32.xlu0 %v35_v5 }
   0xe   :  { %v42_v11 = vadd.f32 %v232_v7, %v41_v10  ;;  %183 = vmatpush.xpose.msk.msra.mxu0 %vm31_vm0, %v25_v25  ;;  %201 = vmatpush.xpose.msk.msra.mxu1 %vm31_vm0, %v25_v25 }
  0x10   :  { %v44_v12 = vsel %vm43_vm1, %v232_v7, %v42_v11 }
  0x12   :  { %184 = vmatpush.xpose.msk.msra.mxu0 %vm31_vm0, %v24_v28  ;;  %202 = vmatpush.xpose.msk.msra.mxu1 %vm31_vm0, %v24_v28 }
  0x16   :  { %185 = vmatpush.xpose.msk.msra.mxu0 %vm31_vm0, %v23_v34  ;;  %203 = vmatpush.xpose.msk.msra.mxu1 %vm31_vm0, %v23_v34 }
  0x1a   :  { %186 = vmatpush.xpose.msk.msra.mxu0 %vm31_vm0, %v22_v39  ;;  %204 = vmatpush.xpose.msk.msra.mxu1 %vm31_vm0, %v22_v39 }
  0x1e   :  { %187 = vmatpush.xpose.msk.msra.mxu0 %vm31_vm0, %v21_v43  ;;  %205 = vmatpush.xpose.msk.msra.mxu1 %vm31_vm0, %v21_v43 }
  0x22   :  { %188 = vmatpush.xpose.msk.msra.mxu0 %vm31_vm0, %v20_v46  ;;  %206 = vmatpush.xpose.msk.msra.mxu1 %vm31_vm0, %v20_v46 }
  0x26   :  { %189 = vmatpush.xpose.msk.msra.mxu0 %vm31_vm0, %v19_v48  ;;  %207 = vmatpush.xpose.msk.msra.mxu1 %vm31_vm0, %v19_v48 }
  0x2a   :  { %190 = vmatpush.xpose.msk.msra.mxu0 %vm31_vm0, %v18_v49  ;;  %208 = vmatpush.xpose.msk.msra.mxu1 %vm31_vm0, %v18_v49 }
  0x2e   :  { %191 = vmatpush.xpose.msk.msra.mxu0 %vm31_vm0, %v17_v50  ;;  %209 = vmatpush.xpose.msk.msra.mxu1 %vm31_vm0, %v17_v50 }
  0x32   :  { %192 = vmatpush.xpose.msk.msra.mxu0 %vm31_vm0, %v16_v51  ;;  %210 = vmatpush.xpose.msk.msra.mxu1 %vm31_vm0, %v16_v51 }
  0x36   :  { %193 = vmatpush.xpose.msk.msra.mxu0 %vm31_vm0, %v15_v52  ;;  %211 = vmatpush.xpose.msk.msra.mxu1 %vm31_vm0, %v15_v52 }
  0x3a   :  { %194 = vmatpush.xpose.msk.msra.mxu0 %vm31_vm0, %v14_v53  ;;  %212 = vmatpush.xpose.msk.msra.mxu1 %vm31_vm0, %v14_v53 }
  0x3e   :  { %195 = vmatpush.xpose.msk.msra.mxu0 %vm31_vm0, %v13_v54  ;;  %213 = vmatpush.xpose.msk.msra.mxu1 %vm31_vm0, %v13_v54 }
  0x78   :  { %v34_v13 = vpop.xlane.xlu0 %33 }
  0x79   :  { %v45_v14 = vmul.f32 %v44_v12, %v34_v13 }
  0x7b   :  { %v47_v15 = vadd.f32 1e-06, %v45_v14 }
  0x7d   :  { %233 = vrsqrt.f32 %v47_v15  ;;  %vm55_vm3 = vweird.f32 %v47_v15 }
  0x80   :  { %v37_v18 = vpop.xlane.xlu0 %36 }
  0x81   :  { %v46_v19 = vmul.f32 %v44_v12, %v37_v18 }
  0x83   :  { %v234_v21 = vpop.eup %233  ;;  %v48_v22 = vadd.f32 1e-06, %v46_v19 }
  0x84   :  { %v50_v23 = vmul.f32 %v234_v21, %v47_v15  ;;  %vm56_vm2 = vweird.f32 %v234_v21 }
  0x85   :  { %235 = vrsqrt.f32 %v48_v22  ;;  %vm57_vm4 = vmor %vm55_vm3, %vm56_vm2  ;;  %vm65_vm6 = vweird.f32 %v48_v22 }
  0x86   :  { %v51_v24 = vmul.f32 %v234_v21, %v50_v23 }
  0x88   :  { %v52_v26 = vmul.f32 0.5, %v51_v24 }
  0x8a   :  { %v53_v27 = vsub.f32 1.5, %v52_v26 }
  0x8b   :  { %v236_v29 = vpop.eup %235 }
  0x8c   :  { %v60_v30 = vmul.f32 %v236_v29, %v48_v22  ;;  %v54_v31 = vmul.f32 %v234_v21, %v53_v27  ;;  %vm66_vm5 = vweird.f32 %v236_v29 }
  0x8d   :  { %vm67_vm7 = vmor %vm65_vm6, %vm66_vm5 }
  0x8e   :  { %v61_v32 = vmul.f32 %v236_v29, %v60_v30  ;;  %v58_v33 = vsel %vm57_vm4, %v234_v21, %v54_v31 }
  0x8f   :  { %v69_v35 = vmul.f32 %v58_v33, %v11_v0 }
  0x90   :  { %v62_v36 = vmul.f32 0.5, %v61_v32 }
  0x91   :  { %v71_v37 = vand.u32 2147483647, %v69_v35 }
  0x92   :  { %v63_v38 = vsub.f32 1.5, %v62_v36 }
  0x93   :  { %v73_v40 = vsel %vm31_vm0, %v71_v37, -inf }
  0x94   :  { %74 = vmax.xlane.f32.xlu1 %v73_v40  ;;  %v64_v41 = vmul.f32 %v236_v29, %v63_v38 }
  0x96   :  { %v68_v42 = vsel %vm67_vm7, %v236_v29, %v64_v41 }
  0x97   :  { %v70_v44 = vmul.f32 %v68_v42, %v263_v2 }
  0x99   :  { %v72_v45 = vand.u32 2147483647, %v70_v44 }
  0x9b   :  { %v76_v47 = vsel %vm31_vm0, %v72_v45, -inf }
  0x9c   :  { %77 = vmax.xlane.f32.xlu1 %v76_v47 }
 0x107   :  { %v75_v55 = vpop.xlane.xlu1 %74 }
 0x108   :  { %v79_v56 = vmax.f32 %v75_v55, 1e-05 }
 0x10a   :  { %237 = vrcp.f32 %v79_v56  ;;  %v85_v11 = vmul.f32 0.007874016, %v79_v56 }
 0x10f   :  { %v78_v57 = vpop.xlane.xlu1 %77 }
 0x110   :  { %v238_v58 = vpop.eup %237  ;;  %v80_v59 = vmax.f32 %v78_v57, 1e-05 }
 0x111   :  { %v83_v60 = vmul.f32 127.0, %v238_v58 }
 0x112   :  { %239 = vrcp.f32 %v80_v59  ;;  %v86_v20 = vmul.f32 0.007874016, %v80_v59 }
 0x113   :  { %v87_v61 = vmul.f32 %v83_v60, %v69_v35 }
 0x115   :  { %v216_v62 = vcvt.f32.s32 %v87_v61  ;;  %v214_v1 = vand.u32 2147483647, %v87_v61  ;;  %v219_v4 = vand.u32 2147483648, %v87_v61 }
 0x117   :  { %v217_v63 = vcvt.s32.f32 %v216_v62  ;;  %vm215_vm8 = vcmp.lt.f32.partialorder %v214_v1, 8388608.0 }
 0x118   :  { %v240_v0 = vpop.eup %239 }
 0x119   :  { %v84_v2 = vmul.f32 127.0, %v240_v0  ;;  %v218_v3 = vand.u32 2147483647, %v217_v63 }
 0x11b   :  { %v88_v5 = vmul.f32 %v84_v2, %v70_v44  ;;  %v220_v6 = vor.u32 %v219_v4, %v218_v3 }
 0x11d   :  { %v224_v7 = vcvt.f32.s32 %v88_v5  ;;  %v221_v8 = vsel %vm215_vm8, %v220_v6, %v87_v61  ;;  %v222_v12 = vand.u32 2147483647, %v88_v5  ;;  %v227_v15 = vand.u32 2147483648, %v88_v5 }
 0x11e   :  { %v91_v9 = vmax.f32 %v221_v8, -128.0 }
 0x11f   :  { %v225_v10 = vcvt.s32.f32 %v224_v7  ;;  %vm223_vm9 = vcmp.lt.f32.partialorder %v222_v12, 8388608.0 }
 0x120   :  { %v93_v13 = vmin.f32 %v91_v9, 127.0 }
 0x121   :  { %v226_v14 = vand.u32 2147483647, %v225_v10 }
 0x122   :  { %v95_v16 = vmul.f32 %v93_v13, %v85_v11 }
 0x123   :  { %v228_v17 = vor.u32 %v227_v15, %v226_v14 }
 0x124   :  { %196 = vmatmul.msk.f32.vlgmr.msra.gmra.mxu0 %vm31_vm0, %v95_v16 }
 0x125   :  { %v229_v18 = vsel %vm223_vm9, %v228_v17, %v88_v5 }
 0x126   :  { %v92_v19 = vmax.f32 %v229_v18, -128.0 }
 0x128   :  { %v94_v21 = vmin.f32 %v92_v19, 127.0 }
 0x12a   :  { %v96_v22 = vmul.f32 %v94_v21, %v86_v20 }
 0x12c   :  { %197 = vmatmul.msk.f32.vlgmr.msra.gmra.mxu1 %vm31_vm0, %v96_v22 }
 0x1a1   :  { %v168_v23 = vpop.f32.mrf.mxu0 }
 0x1a2   :  { %174 = vst [vmem:[%s362_s2] sm:$0xff] %v168_v23 }
 0x1a9   :  { %v171_v24 = vpop.f32.mrf.mxu1 }
 0x1aa   :  { %175 = vst [vmem:[%s362_s2 + $0x8] sm:$0xff] %v171_v24 }

// kernel: multimodal_cross_attention.6
= control target key start
LH: loop header
LB: loop body
LE: loop exit
PB: predicated region body
PF: predicated region fallthrough
CT: control target
= control target key end

     0   :  { %s726_s12 = smov 0   ;;  %s728_s13 = smov 0   ;;  %s795_s0 = inlined_call_operand.vmem [shape: f32[2,4,8,16], index: 0, kind: input, shape index: {}]   ;;  %s796_s1 = inlined_call_operand.vmem [shape: f32[2,4,8,16], index: 1, kind: input, shape index: {}]   ;;  %s797_s2 = inlined_call_operand.vmem [shape: f32[2,4,8,16], index: 2, kind: input, shape index: {}]   ;;  %s798_s3 = inlined_call_operand.vmem [shape: f32[2,4,8,16], index: 3, kind: output, shape index: {}]  }
   0x1   :  { %s730_s14 = smov 0  }
   0x2 LB: > { %s25_s15 = sadd.s32 1, %s700_s13  ;;  %p615_p0 = scmp.ge.s32.totalorder %s704_s14, 1  ;;  %s704_s14 = sphi %s730_s14, %s13_s14   ;;  %s700_s13 = sphi %s728_s13, %s800_s13   ;;  %s696_s12 = sphi %s726_s12, %s799_s12  }
   0x3   : > { %p27_p1 = scmp.ge.s32.totalorder %s25_s15, 2  ;;  %p176_p2 = scmp.lt.s32.totalorder %s704_s14, 3 }
   0x5   : > { %s802_s15 = smov (%p27_p1, %s25_s15), 0  ;;  %p177_p3 = pnand %p615_p0, %p176_p2 }
   0x6   : > { %p216_p4 = scmp.lt.s32.totalorder (!%p177_p3), %s696_s12, 1 }
   0x7   : > { %180 = sbr.rel (%p177_p3) target bundleno = 548 (0x224), region = 32 }
   0xc   : > { %s804_s12 = smov (!%p216_p4, %s696_s12), 1  ;;  %vm254_vm0 = vcmask 130048   ;;  %vm363_vm1 = vcmask 64512  }
   0xd   : > { %s744_s16 = sshll.u32 %s804_s12, 5 }
   0xe   : > { %s228_s19 = scalar_lea.vmem %s796_s1, %s744_s16  ;;  %s223_s22 = scalar_lea.vmem %s795_s0, %s744_s16 }
   0xf   : > { %v246_v0 = vld [vmem:[%s228_s19] sm:$0xff]  ;;  %v248_v1 = vld [vmem:[%s228_s19 + $0x10] sm:$0xff]  ;;  %v247_v4 = vld [vmem:[%s228_s19 + $0x8] sm:$0xff]  ;;  %s233_s25 = scalar_lea.vmem %s797_s2, %s744_s16  ;;  %s241_s28 = scalar_lea.vmem %s798_s3, %s744_s16 }
  0x10   : > { %v242_v2 = vld [vmem:[%s223_s22] sm:$0xff]  ;;  %624 = vmatpush.xpose.msk.msra.mxu0 %vm254_vm0, %v246_v0  ;;  %628 = vmatpush.xpose.msk.msra.mxu2 %vm254_vm0, %v248_v1  ;;  %v244_v3 = vld [vmem:[%s223_s22 + $0x10] sm:$0xff]  ;;  %v249_v5 = vld [vmem:[%s228_s19 + $0x18] sm:$0xff] }
  0x11   : > { %626 = vmatpush.xpose.msk.msra.mxu1 %vm254_vm0, %v247_v4  ;;  %630 = vmatpush.xpose.msk.msra.mxu3 %vm254_vm0, %v249_v5  ;;  %v243_v6 = vld [vmem:[%s223_s22 + $0x8] sm:$0xff]  ;;  %v245_v7 = vld [vmem:[%s223_s22 + $0x18] sm:$0xff]  ;;  %v250_v40 = vld [vmem:[%s233_s25] sm:$0xff] }
  0x12   : > { %v252_v41 = vld [vmem:[%s233_s25 + $0x10] sm:$0xff]  ;;  %v251_v42 = vld [vmem:[%s233_s25 + $0x8] sm:$0xff]  ;;  %v253_v43 = vld [vmem:[%s233_s25 + $0x18] sm:$0xff] }
  0x13   : > { %625 = vmatmul.msk.f32.vlgmr.msra.gmra.mxu0 %vm254_vm0, %v242_v2  ;;  %629 = vmatmul.msk.f32.vlgmr.msra.gmra.mxu2 %vm254_vm0, %v244_v3 }
  0x14   : > { %627 = vmatmul.msk.f32.vlgmr.msra.gmra.mxu1 %vm254_vm0, %v243_v6  ;;  %631 = vmatmul.msk.f32.vlgmr.msra.gmra.mxu3 %vm254_vm0, %v245_v7 }
  0x15   : > { %426 = vmatpush.msrb.mxu0 %v250_v40  ;;  %472 = vmatpush.msrb.mxu2 %v252_v41 }
  0x16   : > { %449 = vmatpush.msrb.mxu1 %v251_v42  ;;  %495 = vmatpush.msrb.mxu3 %v253_v43 }
  0x90   : > { %v278_v8 = vpop.f32.mrf.mxu0 }
  0x91   : > { %v359_v9 = vmul.f32 0.25, %v278_v8  ;;  %v304_v10 = vpop.f32.mrf.mxu1 }
  0x92   : > { %v360_v12 = vmul.f32 0.25, %v304_v10 }
  0x93   : > { %v364_v11 = vsel %vm363_vm1, %v359_v9, -inf }
  0x94   : > { %365 = vmax.xlane.f32.xlu1 %v364_v11  ;;  %v367_v17 = vsel %vm363_vm1, %v360_v12, -inf }
  0x96   : > { %v330_v13 = vpop.f32.mrf.mxu2 }
  0x97   : > { %v361_v14 = vmul.f32 0.25, %v330_v13  ;;  %v356_v15 = vpop.f32.mrf.mxu3 }
  0x98   : > { %v362_v18 = vmul.f32 0.25, %v356_v15 }
  0x99   : > { %v370_v16 = vsel %vm363_vm1, %v361_v14, -inf }
  0x9a   : > { %371 = vmax.xlane.f32.xlu0 %v370_v16  ;;  %v373_v19 = vsel %vm363_vm1, %v362_v18, -inf }
  0x9c   : > { %368 = vmax.xlane.f32.xlu1 %v367_v17 }
  0xa2   : > { %374 = vmax.xlane.f32.xlu0 %v373_v19 }
 0x107   : > { %v366_v20 = vpop.xlane.xlu1 %365 }
 0x108   : > { %v376_v21 = vsub.f32 %v359_v9, %v366_v20 }
 0x10a   : > { %v380_v22 = vmul.f32 1.442695, %v376_v21 }
 0x10c   : > { %666 = vpow2.f32 %v380_v22 }
 0x10d   : > { %v372_v23 = vpop.xlane.xlu0 %371 }
 0x10e   : > { %v378_v24 = vsub.f32 %v361_v14, %v372_v23 }
 0x10f   : > { %v369_v25 = vpop.xlane.xlu1 %368 }
 0x110   : > { %v384_v26 = vmul.f32 1.442695, %v378_v24  ;;  %v377_v27 = vsub.f32 %v360_v12, %v369_v25 }
 0x112   : > { %v667_v28 = vpop.eup %666  ;;  %668 = vpow2.f32 %v384_v26  ;;  %v382_v29 = vmul.f32 1.442695, %v377_v27 }
 0x113   : > { %v388_v30 = vsel %vm363_vm1, %v667_v28, 0.0 }
 0x114   : > { %670 = vpow2.f32 %v382_v29  ;;  %389 = vadd.xlane.f32.xlu0 %v388_v30 }
 0x115   : > { %v375_v31 = vpop.xlane.xlu0 %374 }
 0x116   : > { %v379_v32 = vsub.f32 %v362_v18, %v375_v31 }
 0x118   : > { %v669_v33 = vpop.eup %668  ;;  %v386_v34 = vmul.f32 1.442695, %v379_v32 }
 0x119   : > { %v394_v35 = vsel %vm363_vm1, %v669_v33, 0.0 }
 0x11a   : > { %v671_v36 = vpop.eup %670  ;;  %672 = vpow2.f32 %v386_v34  ;;  %395 = vadd.xlane.f32.xlu2 %v394_v35 }
 0x11b   : > { %v391_v37 = vsel %vm363_vm1, %v671_v36, 0.0 }
 0x11c   : > { %392 = vadd.xlane.f32.xlu1 %v391_v37 }
 0x120   : > { %v673_v38 = vpop.eup %672 }
 0x121   : > { %v397_v39 = vsel %vm363_vm1, %v673_v38, 0.0 }
 0x122   : > { %398 = vadd.xlane.f32.xlu2 %v397_v39 }
 0x187   : > { %v390_v44 = vpop.xlane.xlu0 %389 }
 0x188   : > { %674 = vrcp.f32 %v390_v44 }
 0x18d   : > { %v396_v45 = vpop.xlane.xlu2 %395 }
 0x18e   : > { %v675_v46 = vpop.eup %674  ;;  %676 = vrcp.f32 %v396_v45 }
 0x18f   : > { %v404_v47 = vmul.f32 %v675_v46, %v667_v28  ;;  %v393_v48 = vpop.xlane.xlu1 %392 }
 0x190   : > { %678 = vrcp.f32 %v393_v48 }
 0x191   : > { %632 = vmatmul.msk.f32.vlgmr.msrb.gmra.mxu0 %vm363_vm1, %v404_v47 }
 0x194   : > { %v677_v49 = vpop.eup %676 }
 0x195   : > { %v399_v50 = vpop.xlane.xlu2 %398  ;;  %v406_v51 = vmul.f32 %v677_v49, %v669_v33 }
 0x196   : > { %v679_v52 = vpop.eup %678  ;;  %680 = vrcp.f32 %v399_v50 }
 0x197   : > { %v405_v53 = vmul.f32 %v679_v52, %v671_v36  ;;  %634 = vmatmul.msk.f32.vlgmr.msrb.gmra.mxu2 %vm363_vm1, %v406_v51 }
 0x199   : > { %633 = vmatmul.msk.f32.vlgmr.msrb.gmra.mxu1 %vm363_vm1, %v405_v53 }
 0x19c   : > { %v681_v54 = vpop.eup %680 }
 0x19d   : > { %v407_v55 = vmul.f32 %v681_v54, %v673_v38 }
 0x19f   : > { %635 = vmatmul.msk.f32.vlgmr.msrb.gmra.mxu3 %vm363_vm1, %v407_v55 }
 0x20e   : > { %v428_v56 = vpop.f32.mrf.mxu0 }
 0x20f   : > { %500 = vst.msk [vmem:[%s241_s28] sm:$0xff] %vm254_vm0, %v428_v56 }
 0x216   : > { %v451_v57 = vpop.f32.mrf.mxu1 }
 0x217   : > { %501 = vst.msk [vmem:[%s241_s28 + $0x8] sm:$0xff] %vm254_vm0, %v451_v57 }
 0x21a   : > { %v474_v58 = vpop.f32.mrf.mxu2 }
 0x21b   : > { %502 = vst.msk [vmem:[%s241_s28 + $0x10] sm:$0xff] %vm254_vm0, %v474_v58 }
 0x222   : > { %v497_v59 = vpop.f32.mrf.mxu3 }
 0x223   : > { %503 = vst.msk [vmem:[%s241_s28 + $0x18] sm:$0xff] %vm254_vm0, %v497_v59 }
 0x224 PF: > { %s13_s14 = sadd.s32 1, %s704_s14   ;;  %s799_s12 = smov %s700_s13 }
 0x225   : > { %p10_p5 = scmp.ge.s32.totalorder %s13_s14, 4   ;;  %s800_s13 = smov %s802_s15 }
 0x227   :  { %12 = sbr.rel (!%p10_p5) target bundleno = 2 (0x2), region = 68 }

// kernel: multimodal_cross_attention.7
= control target key start
LH: loop header
LB: loop body
LE: loop exit
PB: predicated region body
PF: predicated region fallthrough
CT: control target
= control target key end

     0   :  { %vm20_vm0 = vcmask 523264   ;;  %s268_s0 = inlined_call_operand.vmem [shape: f32[16,64], index: 0, kind: input, shape index: {}]   ;;  %s269_s1 = inlined_call_operand.vmem [shape: f32[32,64], index: 1, kind: input, shape index: {}]   ;;  %s270_s2 = inlined_call_operand.hbm [shape: f32[16,32], index: 2, kind: output, shape index: {}]  }
   0x1   :  { %v12_v0 = vld [vmem:[%s268_s0] sm:$0xff] }
   0x2   :  { %7 = vsyncpa [#allocation3], 0  ;;  %v18_v1 = vmul.f32 %v12_v0, %v12_v0  ;;  %v13_v2 = vld [vmem:[%s268_s0 + $0x8] sm:$0xff]  ;;  %v214_v6 = vmov 64.0   ;;  %v17_v39 = vld [vmem:[%s269_s1 + $0x18] sm:$0xff]  ;;  %vm127_vm10 = vcmask 261120  }
   0x3   :  { %v19_v4 = vmul.f32 %v13_v2, %v13_v2  ;;  %178 = vrcp.f32 %v214_v6  ;;  %148 = vmatpush.xpose.msk.msra.mxu0 %vm20_vm0, %v17_v39  ;;  %154 = vmatpush.xpose.msk.msra.mxu1 %vm20_vm0, %v17_v39  ;;  %v16_v40 = vld [vmem:[%s269_s1 + $0x10] sm:$0xff]  ;;  %v15_v41 = vld [vmem:[%s269_s1 + $0x8] sm:$0xff]  ;;  %v14_v42 = vld [vmem:[%s269_s1] sm:$0xff]  ;;  %s215_s1 = smov [#allocation2]   ;;  %s136_s23 = sshll.u32 %s270_s2, 4  ;;  %s137_s23 = int_to_ptr.hbm [resolvable:$true] %s136_s23 }
   0x4   :  { %v21_v3 = vsel %vm20_vm0, %v18_v1, 0.0  ;;  %s134_s20 = sshll.u32 %s215_s1, 4  ;;  %s216_s24 = smov 128   ;;  %s135_s20 = int_to_ptr.vmem [resolvable:$true] %s134_s20 }
   0x5   :  { %22 = vadd.xlane.f32.xlu0 %v21_v3  ;;  %v24_v5 = vsel %vm20_vm0, %v19_v4, 0.0  ;;  %s217_s25 = smov 8  }
   0x7   :  { %149 = vmatpush.xpose.msk.msra.mxu0 %vm20_vm0, %v16_v40  ;;  %155 = vmatpush.xpose.msk.msra.mxu1 %vm20_vm0, %v16_v40 }
   0x9   :  { %v179_v7 = vpop.eup %178 }
   0xa   :  { %v28_v8 = vmul.f32 64.0, %v179_v7  ;;  %vm32_vm1 = vweird.f32 %v179_v7 }
   0xb   :  { %150 = vmatpush.xpose.msk.msra.mxu0 %vm20_vm0, %v15_v41  ;;  %156 = vmatpush.xpose.msk.msra.mxu1 %vm20_vm0, %v15_v41 }
   0xc   :  { %v29_v9 = vsub.f32 1.0, %v28_v8 }
   0xd   :  { %25 = vadd.xlane.f32.xlu0 %v24_v5 }
   0xe   :  { %v30_v10 = vmul.f32 %v179_v7, %v29_v9 }
   0xf   :  { %151 = vmatpush.xpose.msk.msra.mxu0 %vm20_vm0, %v14_v42  ;;  %157 = vmatpush.xpose.msk.msra.mxu1 %vm20_vm0, %v14_v42 }
  0x10   :  { %v31_v11 = vadd.f32 %v179_v7, %v30_v10 }
  0x12   :  { %v33_v12 = vsel %vm32_vm1, %v179_v7, %v31_v11 }
  0x78   :  { %v23_v13 = vpop.xlane.xlu0 %22 }
  0x79   :  { %v34_v14 = vmul.f32 %v33_v12, %v23_v13 }
  0x7b   :  { %v36_v15 = vadd.f32 1e-06, %v34_v14 }
  0x7d   :  { %180 = vrsqrt.f32 %v36_v15  ;;  %vm44_vm3 = vweird.f32 %v36_v15 }
  0x80   :  { %v26_v16 = vpop.xlane.xlu0 %25 }
  0x81   :  { %v35_v17 = vmul.f32 %v33_v12, %v26_v16 }
  0x83   :  { %v181_v18 = vpop.eup %180  ;;  %v37_v19 = vadd.f32 1e-06, %v35_v17 }
  0x84   :  { %v39_v20 = vmul.f32 %v181_v18, %v36_v15  ;;  %vm45_vm2 = vweird.f32 %v181_v18 }
  0x85   :  { %182 = vrsqrt.f32 %v37_v19  ;;  %vm46_vm4 = vmor %vm44_vm3, %vm45_vm2  ;;  %vm54_vm6 = vweird.f32 %v37_v19 }
  0x86   :  { %v40_v21 = vmul.f32 %v181_v18, %v39_v20 }
  0x88   :  { %v41_v22 = vmul.f32 0.5, %v40_v21 }
  0x8a   :  { %v42_v23 = vsub.f32 1.5, %v41_v22 }
  0x8b   :  { %v183_v24 = vpop.eup %182 }
  0x8c   :  { %v49_v25 = vmul.f32 %v183_v24, %v37_v19  ;;  %v43_v26 = vmul.f32 %v181_v18, %v42_v23  ;;  %vm55_vm5 = vweird.f32 %v183_v24 }
  0x8d   :  { %vm56_vm7 = vmor %vm54_vm6, %vm55_vm5 }
  0x8e   :  { %v50_v27 = vmul.f32 %v183_v24, %v49_v25  ;;  %v47_v28 = vsel %vm46_vm4, %v181_v18, %v43_v26 }
  0x8f   :  { %v58_v29 = vmul.f32 %v47_v28, %v12_v0 }
  0x90   :  { %v51_v30 = vmul.f32 0.5, %v50_v27 }
  0x91   :  { %v60_v31 = vand.u32 2147483647, %v58_v29 }
  0x92   :  { %v52_v32 = vsub.f32 1.5, %v51_v30 }
  0x93   :  { %v62_v33 = vsel %vm20_vm0, %v60_v31, -inf }
  0x94   :  { %63 = vmax.xlane.f32.xlu1 %v62_v33  ;;  %v53_v34 = vmul.f32 %v183_v24, %v52_v32 }
  0x96   :  { %v57_v35 = vsel %vm56_vm7, %v183_v24, %v53_v34 }
  0x97   :  { %v59_v36 = vmul.f32 %v57_v35, %v13_v2 }
  0x99   :  { %v61_v37 = vand.u32 2147483647, %v59_v36 }
  0x9b   :  { %v65_v38 = vsel %vm20_vm0, %v61_v37, -inf }
  0x9c   :  { %66 = vmax.xlane.f32.xlu1 %v65_v38 }
 0x107   :  { %v64_v43 = vpop.xlane.xlu1 %63 }
 0x108   :  { %v68_v44 = vmax.f32 %v64_v43, 1e-05 }
 0x10a   :  { %184 = vrcp.f32 %v68_v44  ;;  %v74_v63 = vmul.f32 0.007874016, %v68_v44 }
 0x10f   :  { %v67_v45 = vpop.xlane.xlu1 %66 }
 0x110   :  { %v185_v46 = vpop.eup %184  ;;  %v69_v47 = vmax.f32 %v67_v45, 1e-05 }
 0x111   :  { %v72_v48 = vmul.f32 127.0, %v185_v46 }
 0x112   :  { %186 = vrcp.f32 %v69_v47  ;;  %v75_v8 = vmul.f32 0.007874016, %v69_v47 }
 0x113   :  { %v76_v49 = vmul.f32 %v72_v48, %v58_v29 }
 0x115   :  { %v160_v50 = vcvt.f32.s32 %v76_v49  ;;  %v158_v53 = vand.u32 2147483647, %v76_v49  ;;  %v163_v56 = vand.u32 2147483648, %v76_v49 }
 0x117   :  { %v161_v51 = vcvt.s32.f32 %v160_v50  ;;  %vm159_vm8 = vcmp.lt.f32.partialorder %v158_v53, 8388608.0 }
 0x118   :  { %v187_v52 = vpop.eup %186 }
 0x119   :  { %v73_v54 = vmul.f32 127.0, %v187_v52  ;;  %v162_v55 = vand.u32 2147483647, %v161_v51 }
 0x11b   :  { %v77_v57 = vmul.f32 %v73_v54, %v59_v36  ;;  %v164_v58 = vor.u32 %v163_v56, %v162_v55 }
 0x11d   :  { %v168_v59 = vcvt.f32.s32 %v77_v57  ;;  %v165_v60 = vsel %vm159_vm8, %v164_v58, %v76_v49  ;;  %v166_v0 = vand.u32 2147483647, %v77_v57  ;;  %v171_v3 = vand.u32 2147483648, %v77_v57 }
 0x11e   :  { %v80_v61 = vmax.f32 %v165_v60, -128.0 }
 0x11f   :  { %v169_v62 = vcvt.s32.f32 %v168_v59  ;;  %vm167_vm9 = vcmp.lt.f32.partialorder %v166_v0, 8388608.0 }
 0x120   :  { %v82_v1 = vmin.f32 %v80_v61, 127.0 }
 0x121   :  { %v170_v2 = vand.u32 2147483647, %v169_v62 }
 0x122   :  { %v84_v4 = vmul.f32 %v82_v1, %v74_v63 }
 0x123   :  { %v172_v5 = vor.u32 %v171_v3, %v170_v2 }
 0x124   :  { %152 = vmatmul.msk.f32.vlgmr.msra.gmra.mxu0 %vm20_vm0, %v84_v4 }
 0x125   :  { %v173_v6 = vsel %vm167_vm9, %v172_v5, %v77_v57 }
 0x126   :  { %v81_v7 = vmax.f32 %v173_v6, -128.0 }
 0x128   :  { %v83_v9 = vmin.f32 %v81_v7, 127.0 }
 0x12a   :  { %v85_v10 = vmul.f32 %v83_v9, %v75_v8 }
 0x12c   :  { %153 = vmatmul.msk.f32.vlgmr.msra.gmra.mxu1 %vm20_vm0, %v85_v10 }
 0x1a1   :  { %v121_v11 = vpop.f32.mrf.mxu0 }
 0x1a2   :  { %128 = vst.msk [vmem:[#allocation2] sm:$0xff] %vm127_vm10, %v121_v11 }
 0x1a9   :  { %v124_v12 = vpop.f32.mrf.mxu1 }
 0x1aa   :  { %129 = vst.msk [vmem:[#allocation2 + $0x8] sm:$0xff] %vm127_vm10, %v124_v12 }
 0x1ab   :  { %142 = dma.vmem_to_hbm [thread:$0]  %s135_s20, 256, %s137_s23, [#allocation3], %s216_s24, %s216_s24, %s217_s25  }
 0x1ac   :  { %212 = dma.done.wait [#allocation3], 256  }
 0x1ad   :  { %213 = vsyncadd [#allocation3], 4294967040 }
 0x1ae   :  { %147 = vsyncpa [#allocation3], 1 }

</bundles_post_ra>
